<compile_context>
chip_gen: v5e
topology: v5e:2x2
jax: 0.10.0
libtpu: 0.0.40
codegen_flags: <defaults>
</compile_context>

<pallas_src>
import functools

import jax
import jax.numpy as jnp
from jax.experimental import pallas as pl
from jax.experimental.pallas import tpu as pltpu

_TARGET_CHUNKS = 8            # 4 chunks per TensorCore on v7x -> overlap + balance
_MIN_CHUNK_BYTES = 1 << 20    # do not split below ~1 MiB per DMA
_SMALL_INPUT_BYTES = 4 << 20  # below this the metadata reshape wins outright


# --------------------------------------------------------------------------
# Production path: contiguous reshape == metadata only, zero HBM traffic.
# --------------------------------------------------------------------------
def reshape_1d_to_2d(x, outshape):
    B, C, H, W = outshape
    assert x.shape == (B, C, H * W), f"incompatible shapes {x.shape} vs {outshape}"
    return x.reshape(B, C, H, W)


# --------------------------------------------------------------------------
# Explicit Pallas copy (data-movement exercise / benchmark path).
# --------------------------------------------------------------------------
def _dtype_sublanes(dtype):
    """Native sublane packing: 8 rows per f32 vreg, 16 for bf16, 32 for int8/fp8."""
    return 8 * max(1, 4 // jnp.dtype(dtype).itemsize)


def _pick_row_chunks(rows, row_bytes, sublanes):
    """Split `rows` into a small number of large, sublane-aligned DMA chunks.

    Returns (n_chunks, tile_r, tail_r) with
      rows == (n_chunks - 1) * tile_r + tail_r   and   0 < tail_r <= tile_r.
    """
    total = rows * row_bytes
    n_chunks = max(1, min(_TARGET_CHUNKS, total // _MIN_CHUNK_BYTES))
    tile_r = pl.cdiv(rows, n_chunks)
    if rows >= sublanes:
        # Keep chunk boundaries on native (sublane-packed) tile rows.
        tile_r = pl.cdiv(tile_r, sublanes) * sublanes
    tile_r = min(tile_r, rows)
    n_chunks = pl.cdiv(rows, tile_r)
    tail_r = rows - (n_chunks - 1) * tile_r
    return n_chunks, tile_r, tail_r


def _dma_copy_kernel(tile_r, tail_r, x_ref, o_ref, sem):
    """One grid step = one direct HBM->HBM DMA of tile_r (or tail_r) rows."""
    i = pl.program_id(0)
    n = pl.num_programs(0)

    def copy_rows(start, size):
        cp = pltpu.make_async_copy(
            x_ref.at[pl.ds(start, size), :],
            o_ref.at[pl.ds(start, size), :],
            sem,
        )
        cp.start()
        cp.wait()

    if tail_r == tile_r:
        # Uniform chunks: single code path, dynamic row offset.
        copy_rows(i * tile_r, tile_r)
    else:
        @pl.when(i < n - 1)
        def _():
            copy_rows(i * tile_r, tile_r)

        @pl.when(i == n - 1)
        def _():
            copy_rows((n - 1) * tile_r, tail_r)


def reshape_1d_to_2d_pallas(x, outshape, *, force=False):
    """Same result as reshape_1d_to_2d, but the data movement is performed by
    an explicit Pallas kernel using direct HBM->HBM DMAs (no VMEM staging)."""
    B, C, H, W = outshape
    assert x.shape == (B, C, H * W), f"incompatible shapes {x.shape} vs {outshape}"

    rows, cols = B * C, H * W
    itemsize = jnp.dtype(x.dtype).itemsize

    # Small-input early-out: launch + DMA-descriptor cost dwarfs the copy; the
    # metadata reshape is free.  `force=True` keeps the kernel exercisable.
    if not force and rows * cols * itemsize < _SMALL_INPUT_BYTES:
        return x.reshape(B, C, H, W)

    n_chunks, tile_r, tail_r = _pick_row_chunks(
        rows, cols * itemsize, _dtype_sublanes(x.dtype)
    )

    # Metadata-only re-layout of (B, C, L) into the flat (B*C, L) slab the
    # DMAs chunk over.
    x2d = x.reshape(rows, cols)

    out2d = pl.pallas_call(
        functools.partial(_dma_copy_kernel, tile_r, tail_r),
        out_shape=jax.ShapeDtypeStruct((rows, cols), x.dtype),
        grid=(n_chunks,),
        # Raw HBM refs on both sides -> the kernel drives the DMAs itself.
        in_specs=[pl.BlockSpec(memory_space=pl.ANY)],
        out_specs=pl.BlockSpec(memory_space=pl.ANY),
        scratch_shapes=[pltpu.SemaphoreType.DMA],
        compiler_params=pltpu.CompilerParams(
            dimension_semantics=("parallel",),
        ),
    )(x2d)

    # Final shape bookkeeping (pure metadata, like torch .view()).
    return out2d.reshape(B, C, H, W)


if __name__ == "__main__":
    # Small, deterministic example consistent with the module's intent:
    # (B, C, L) = (2, 4, 256) -> (B, C, H, W) = (2, 4, 16, 16).
    B, C, H, W = 2, 4, 16, 16
    L = H * W
    key = jax.random.PRNGKey(0)
    x = jax.random.normal(key, (B, C, L), dtype=jnp.float32)

    # Pure-JAX reference (torch .view semantics).
    ref = x.reshape(B, C, H, W)

    out_prod = reshape_1d_to_2d(x, (B, C, H, W))                     # metadata-only
    out_pallas = reshape_1d_to_2d_pallas(x, (B, C, H, W), force=True)  # HBM->HBM DMA
    out_pallas = jax.block_until_ready(out_pallas)

    assert out_pallas.shape == (B, C, H, W)
    assert out_pallas.dtype == x.dtype
    assert bool(jnp.array_equal(out_prod, ref))
    assert bool(jnp.array_equal(out_pallas, ref))

    print("KERNEL_OK")
</pallas_src>

<mosaic_0001>
module attributes {stable_mosaic.version = 11 : i64} {
  func.func @_dma_copy_kernel(%arg0: i32, %arg1: memref<8x256xf32, #tpu.memory_space<any>>, %arg2: memref<8x256xf32, #tpu.memory_space<any>>, %arg3: memref<!tpu.dma_semaphore, #tpu.memory_space<semaphore_mem>>) attributes {dimension_semantics = [#tpu.dimension_semantics<parallel>], iteration_bounds = array<i64: 1>, scalar_prefetch = 0 : i64, scratch_operands = 1 : i64, tpu.core_type = #tpu.core_type<tc>, window_params = [{}, {}]} {
    %c8_i32 = arith.constant 8 : i32
    %0 = arith.muli %arg0, %c8_i32 : i32
    %c0_i32 = arith.constant 0 : i32
    %1 = tpu.memref_slice %arg1[%0, %c0_i32] : memref<8x256xf32, #tpu.memory_space<any>> -> memref<8x256xf32, #tpu.memory_space<any>>
    %c0_i32_0 = arith.constant 0 : i32
    %2 = tpu.memref_slice %arg2[%0, %c0_i32_0] : memref<8x256xf32, #tpu.memory_space<any>> -> memref<8x256xf32, #tpu.memory_space<any>>
    tpu.enqueue_dma source(%1 : memref<8x256xf32, #tpu.memory_space<any>>) target(%2 : memref<8x256xf32, #tpu.memory_space<any>>) target_semaphore(%arg3 : memref<!tpu.dma_semaphore, #tpu.memory_space<semaphore_mem>>)
    %c0_i32_1 = arith.constant 0 : i32
    %3 = tpu.memref_slice %arg1[%0, %c0_i32_1] : memref<8x256xf32, #tpu.memory_space<any>> -> memref<8x256xf32, #tpu.memory_space<any>>
    %c0_i32_2 = arith.constant 0 : i32
    %4 = tpu.memref_slice %arg2[%0, %c0_i32_2] : memref<8x256xf32, #tpu.memory_space<any>> -> memref<8x256xf32, #tpu.memory_space<any>>
    tpu.wait_dma2 semaphore(%arg3 : memref<!tpu.dma_semaphore, #tpu.memory_space<semaphore_mem>>) src(%3 : memref<8x256xf32, #tpu.memory_space<any>>) dst(%4 : memref<8x256xf32, #tpu.memory_space<any>>)
    return
  }
}

</mosaic_0001>

<bundles_post_ra>
// kernel: tpu_custom_call.1
= control target key start
LH: loop header
LB: loop body
LE: loop exit
PB: predicated region body
PF: predicated region fallthrough
CT: control target
= control target key end

     0   :  { %s45_s12 = smov [#allocation2]   ;;  %s46_s13 = smov [#allocation3]   ;;  %s64_s0 = inlined_call_operand.hbm [shape: f32[8,256], index: 0, kind: input, shape index: {}]   ;;  %s65_s1 = inlined_call_operand.hbm [shape: f32[8,256], index: 1, kind: output, shape index: {}]  }
   0x1   :  { %s18_s8 = sshll.u32 %s64_s0, 4  ;;  %s20_s11 = sshll.u32 %s65_s1, 4  ;;  %s19_s8 = int_to_ptr.hbm [resolvable:$true] %s18_s8  ;;  %s21_s11 = int_to_ptr.hbm [resolvable:$true] %s20_s11 }
   0x2   :  { %s47_s14 = smov 0  }
   0x3   :  { %24 = dma.general %s19_s8, 256, %s21_s11, %s45_s12, %s46_s13, [#allocation4], %s47_s14, 0  }
   0x4   :  { %43 = dma.done.wait [#allocation2], 256 }
   0x5   :  { %44 = vsyncadd [#allocation2], 4294967040 }
   0x6   :  { %29 = vsyncmov [#allocation2] }
   0x9   :  { %s30_s15 = vpop.sfrf %29 }
   0xa   :  { %p39_p0 = scmp.ne.s32.totalorder %s30_s15, 0 }
   0xc   :  { %34 = shalt.err (%p39_p0)  }

</bundles_post_ra>
